<compile_context>
chip_gen: v7x
topology: tpu7x:2x2x1
jax: 0.10.0
libtpu: 0.0.40
codegen_flags: <defaults>
</compile_context>

<pallas_src>
import functools

import jax
import jax.numpy as jnp
from jax.experimental import pallas as pl
from jax.experimental.pallas import tpu as pltpu


def _round_up(v, m):
    return ((v + m - 1) // m) * m


def _luong_attn_kernel(x_ref, mem_ref, w1_ref, b1_ref, w2x_ref, w2c_ref, b2_ref,
                       out_ref, score_ref, *, sl):
    x = x_ref[...]                                     # (tb, nh)
    mem = mem_ref[...]                                 # (tb, sl_p, hd)
    sl_p = mem_ref.shape[1]

    # Linear 1 for the whole batch tile on the MXU: (tb, nh) @ (nh, hd) + b1.
    h1 = jnp.dot(x, w1_ref[...], preferred_element_type=jnp.float32) + b1_ref[...]

    # Bilinear score for the whole tile: VPU broadcast-multiply + lane reduce.
    bil = jnp.sum(h1[:, None, :] * mem, axis=-1)       # (tb, sl_p)

    # Mask the lane-padding columns (sl was padded up to sl_p in the wrapper).
    if sl_p != sl:
        col = jax.lax.broadcasted_iota(jnp.int32, bil.shape, 1)
        bil = jnp.where(col < sl, bil, -jnp.inf)

    # Tile-wide numerically stable softmax; reciprocal goes to the EUP slot.
    m = jnp.max(bil, axis=-1, keepdims=True)
    e = jnp.exp(bil - m)
    denom = jnp.sum(e, axis=-1, keepdims=True)
    score = e * pl.reciprocal(denom, approx=True)

    # Context vector for the whole tile: broadcast-multiply + sublane reduce.
    # (Padded sl rows of `mem` are zero and their scores are zero => exact.)
    c = jnp.sum(score[:, :, None] * mem, axis=1)       # (tb, hd)

    # Combine Linear without the lane-axis concat: tanh(x@W2x + c@W2c + b2), MXU.
    out = jnp.tanh(
        jnp.dot(x, w2x_ref[...], preferred_element_type=jnp.float32)
        + jnp.dot(c, w2c_ref[...], preferred_element_type=jnp.float32)
        + b2_ref[...])

    # Dense, lane-wide stores (last dims are 128-multiples via wrapper padding).
    out_ref[...] = out.astype(out_ref.dtype)
    score_ref[...] = score.astype(score_ref.dtype)


def luong_attn(x, memory, w1, b1, w2, b2, *,
               vmem_budget_bytes=48 * 1024 * 1024, batch_tile=None):
    """Fused Luong attention.

    Weights in PyTorch nn.Linear layout:
      w1: (hidden*dir, input_size), b1: (hidden*dir,)
      w2: (hidden, input_size + hidden*dir), b2: (hidden,)

    vmem_budget_bytes: per-step VMEM budget used to size the batch tile.
      Default 48 MiB fits v7x (64 MiB physical VMEM); raise to ~96 MiB on
      v5e / v6e (128 MiB VMEM) for larger, more HBM-efficient tiles.
    """
    bs, nh = x.shape
    bs_m, sl, hd = memory.shape
    assert bs_m == bs
    hidden = w2.shape[0]
    assert w1.shape == (hd, nh)
    assert w2.shape == (hidden, nh + hd)

    # Lane-dense output padding: score last dim (sl) and output last dim
    # (hidden) are padded to multiples of 128 so stores are unmasked vst.
    sl_p = _round_up(sl, 128)
    hidden_p = _round_up(hidden, 128)

    # PyTorch (out, in) -> (in, out); split W2 so the concat disappears.
    w1_io = w1.T                                   # (nh, hd)
    w2_io = w2.T                                   # (nh + hd, hidden)
    w2x = w2_io[:nh]                               # (nh, hidden) -> multiplies x
    w2c = w2_io[nh:]                               # (hd, hidden) -> multiplies c
    if hidden_p != hidden:
        pad_w = ((0, 0), (0, hidden_p - hidden))
        w2x = jnp.pad(w2x, pad_w)
        w2c = jnp.pad(w2c, pad_w)
        b2 = jnp.pad(b2, (0, hidden_p - hidden))
    b1_2d = b1.reshape(1, hd)
    b2_2d = b2.reshape(1, hidden_p)

    mem_p = memory
    if sl_p != sl:
        mem_p = jnp.pad(memory, ((0, 0), (0, sl_p - sl), (0, 0)))

    # ---- Batch tile sizing (the kernel is HBM-bound on the memory stream,
    # ~1 flop/byte, so the tile should fill the VMEM budget).
    # Per batch row: double-buffered memory slab + ~2 tile-sized temporaries
    # inside the kernel + double-buffered x / out / score rows.
    row_bytes = 4 * (4 * sl_p * hd + 2 * nh + 2 * hidden_p + 2 * sl_p)
    resident_bytes = 4 * (nh * hd + hd + nh * hidden_p + hd * hidden_p + hidden_p)
    tb_cap = max(1, (vmem_budget_bytes - resident_bytes) // row_bytes)
    if batch_tile is not None:
        tb_cap = min(tb_cap, batch_tile)

    tb = min(tb_cap, bs)
    if tb >= bs:
        tb = bs
        # v7x has 2 TensorCores per chip; a 1-step grid leaves one idle.
        # Split into 2 steps when it stays layout-clean (multiple-of-8 tiles).
        if bs >= 16 and bs % 16 == 0:
            tb = bs // 2
    else:
        # Second-to-last block dims must be a multiple of 8 (or the full dim).
        tb = max(8, (tb // 8) * 8)
        tb = min(tb, bs)
    grid = (pl.cdiv(bs, tb),)

    # Constant-index weight/bias blocks: single-buffered (no point in 2-deep
    # pipelining something that never changes; frees VMEM for the memory tile).
    resident = dict(pipeline_mode=pl.Buffered(1))

    grid_spec = pltpu.PrefetchScalarGridSpec(
        num_scalar_prefetch=0,
        grid=grid,
        in_specs=[
            pl.BlockSpec((tb, nh), lambda i: (i, 0)),           # x (streamed)
            pl.BlockSpec((tb, sl_p, hd), lambda i: (i, 0, 0)),  # memory (streamed)
            pl.BlockSpec((nh, hd), lambda i: (0, 0), **resident),        # W1
            pl.BlockSpec((1, hd), lambda i: (0, 0), **resident),         # b1
            pl.BlockSpec((nh, hidden_p), lambda i: (0, 0), **resident),  # W2_x
            pl.BlockSpec((hd, hidden_p), lambda i: (0, 0), **resident),  # W2_c
            pl.BlockSpec((1, hidden_p), lambda i: (0, 0), **resident),   # b2
        ],
        out_specs=(
            pl.BlockSpec((tb, hidden_p), lambda i: (i, 0)),     # output
            pl.BlockSpec((tb, sl_p), lambda i: (i, 0)),         # score
        ),
    )

    kernel = functools.partial(_luong_attn_kernel, sl=sl)

    out_p, score_p = pl.pallas_call(
        kernel,
        out_shape=(
            jax.ShapeDtypeStruct((bs, hidden_p), x.dtype),
            jax.ShapeDtypeStruct((bs, sl_p), x.dtype),
        ),
        grid_spec=grid_spec,
        compiler_params=pltpu.CompilerParams(
            dimension_semantics=("parallel",),
            # Scoped-VMEM default is only 16/32 MiB; the tile-sizing budget
            # above keeps actual usage below ~48 MiB so this also fits v7x.
            vmem_limit_bytes=64 * 1024 * 1024,
        ),
    )(x, mem_p, w1_io, b1_2d, w2x, w2c, b2_2d)

    # Slice the lane padding back off.
    return out_p[:, :hidden], score_p[:, :sl]


def reference(x, memory, w1, b1, w2, b2):
    """Pure-JAX reference with PyTorch nn.Linear semantics."""
    h1 = x @ w1.T + b1
    bil = jnp.sum(h1[:, None, :] * memory, axis=-1)
    score = jax.nn.softmax(bil, axis=-1)
    c = jnp.sum(score[:, :, None] * memory, axis=1)
    out = jnp.tanh(jnp.concatenate([x, c], axis=1) @ w2.T + b2)
    return out, score


if __name__ == "__main__":
    # Small shapes consistent with the module's forward contract.
    bs, sl = 2, 8
    input_size, hidden_size, direction = 32, 32, 1
    hd = hidden_size * direction   # memory feature dim must equal hidden*direction

    key = jax.random.PRNGKey(0)
    kx, km, kw1, kb1, kw2, kb2 = jax.random.split(key, 6)

    x = jax.random.normal(kx, (bs, input_size), dtype=jnp.float32)
    memory = jax.random.normal(km, (bs, sl, hd), dtype=jnp.float32)

    # Parameters in PyTorch nn.Linear layout: weight (out, in), bias (out,).
    w1 = jax.random.normal(kw1, (hd, input_size), dtype=jnp.float32) * 0.1
    b1 = jax.random.normal(kb1, (hd,), dtype=jnp.float32) * 0.1
    w2 = jax.random.normal(kw2, (hidden_size, input_size + hd), dtype=jnp.float32) * 0.1
    b2 = jax.random.normal(kb2, (hidden_size,), dtype=jnp.float32) * 0.1

    out, score = luong_attn(x, memory, w1, b1, w2, b2)
    jax.block_until_ready((out, score))

    ref_out, ref_score = reference(x, memory, w1, b1, w2, b2)
    # approx=True reciprocal in the softmax loosens tolerance slightly.
    assert jnp.allclose(score, ref_score, atol=2e-3, rtol=2e-3), "score mismatch"
    assert jnp.allclose(out, ref_out, atol=2e-3, rtol=2e-3), "output mismatch"

    print("KERNEL_OK")
</pallas_src>

<mosaic_0001>
module attributes {stable_mosaic.version = 11 : i64} {
  func.func @_luong_attn_kernel(%arg0: i32, %arg1: memref<2x32xf32, #tpu.memory_space<vmem>>, %arg2: memref<2x128x32xf32, #tpu.memory_space<vmem>>, %arg3: memref<32x32xf32, #tpu.memory_space<vmem>>, %arg4: memref<1x32xf32, #tpu.memory_space<vmem>>, %arg5: memref<32x128xf32, #tpu.memory_space<vmem>>, %arg6: memref<32x128xf32, #tpu.memory_space<vmem>>, %arg7: memref<1x128xf32, #tpu.memory_space<vmem>>, %arg8: memref<2x128xf32, #tpu.memory_space<vmem>>, %arg9: memref<2x128xf32, #tpu.memory_space<vmem>>) attributes {dimension_semantics = [#tpu.dimension_semantics<parallel>], iteration_bounds = array<i64: 1>, scalar_prefetch = 0 : i64, scratch_operands = 0 : i64, tpu.core_type = #tpu.core_type<tc>, window_params = [{transform_indices = @transform_0, window_bounds = array<i64: 2, 32>}, {transform_indices = @transform_1, window_bounds = array<i64: 2, 128, 32>}, {pipeline_mode = #tpu.pipeline_mode<synchronous>, transform_indices = @transform_2, window_bounds = array<i64: 32, 32>}, {pipeline_mode = #tpu.pipeline_mode<synchronous>, transform_indices = @transform_3, window_bounds = array<i64: 1, 32>}, {pipeline_mode = #tpu.pipeline_mode<synchronous>, transform_indices = @transform_4, window_bounds = array<i64: 32, 128>}, {pipeline_mode = #tpu.pipeline_mode<synchronous>, transform_indices = @transform_5, window_bounds = array<i64: 32, 128>}, {pipeline_mode = #tpu.pipeline_mode<synchronous>, transform_indices = @transform_6, window_bounds = array<i64: 1, 128>}, {transform_indices = @transform_7, window_bounds = array<i64: 2, 128>}, {transform_indices = @transform_8, window_bounds = array<i64: 2, 128>}]} {
    %c0 = arith.constant 0 : index
    %c0_0 = arith.constant 0 : index
    %0 = vector.load %arg1[%c0, %c0_0] : memref<2x32xf32, #tpu.memory_space<vmem>>, vector<2x32xf32>
    %c0_1 = arith.constant 0 : index
    %c0_2 = arith.constant 0 : index
    %c0_3 = arith.constant 0 : index
    %1 = vector.load %arg2[%c0_1, %c0_2, %c0_3] : memref<2x128x32xf32, #tpu.memory_space<vmem>>, vector<2x128x32xf32>
    %c0_4 = arith.constant 0 : index
    %c0_5 = arith.constant 0 : index
    %2 = vector.load %arg3[%c0_4, %c0_5] : memref<32x32xf32, #tpu.memory_space<vmem>>, vector<32x32xf32>
    %cst = arith.constant dense<0.000000e+00> : vector<2x32xf32>
    %3 = tpu.matmul %0, %2, %cst {dimension_numbers = #tpu.dot_dimension_numbers<[1], [0], [0], [1], [0, 0, 1, 1], [], []>} : vector<2x32xf32>, vector<32x32xf32>, vector<2x32xf32> -> vector<2x32xf32>
    %c0_6 = arith.constant 0 : index
    %c0_7 = arith.constant 0 : index
    %4 = vector.load %arg4[%c0_6, %c0_7] : memref<1x32xf32, #tpu.memory_space<vmem>>, vector<1x32xf32>
    %5 = vector.broadcast %4 : vector<1x32xf32> to vector<2x32xf32>
    %6 = arith.addf %3, %5 : vector<2x32xf32>
    %7 = vector.shape_cast %6 : vector<2x32xf32> to vector<2x1x32xf32>
    %8 = vector.broadcast %7 : vector<2x1x32xf32> to vector<2x128x32xf32>
    %9 = arith.mulf %8, %1 : vector<2x128x32xf32>
    %cst_8 = arith.constant dense<0.000000e+00> : vector<2x128xf32>
    %10 = vector.multi_reduction <add>, %9, %cst_8 [2] : vector<2x128x32xf32> to vector<2x128xf32>
    %11 = tpu.iota {dimensions = array<i32: 1>} : vector<2x128xi32>
    %c8_i32 = arith.constant 8 : i32
    %12 = vector.broadcast %c8_i32 : i32 to vector<2x128xi32>
    %13 = arith.cmpi slt, %11, %12 : vector<2x128xi32>
    %cst_9 = arith.constant 0xFF800000 : f32
    %14 = vector.broadcast %cst_9 : f32 to vector<2x128xf32>
    %15 = arith.select %13, %10, %14 : vector<2x128xi1>, vector<2x128xf32>
    %cst_10 = arith.constant dense<0xFF800000> : vector<2xf32>
    %16 = vector.multi_reduction <maximumf>, %15, %cst_10 [1] : vector<2x128xf32> to vector<2xf32>
    %17 = vector.shape_cast %16 : vector<2xf32> to vector<2x1xf32>
    %18 = vector.broadcast %17 : vector<2x1xf32> to vector<2x128xf32>
    %19 = arith.subf %15, %18 : vector<2x128xf32>
    %20 = math.exp %19 : vector<2x128xf32>
    %cst_11 = arith.constant dense<0.000000e+00> : vector<2xf32>
    %21 = vector.multi_reduction <add>, %20, %cst_11 [1] : vector<2x128xf32> to vector<2xf32>
    %22 = vector.shape_cast %21 : vector<2xf32> to vector<2x1xf32>
    %23 = tpu.reciprocal %22 {approx = true} : vector<2x1xf32> -> vector<2x1xf32>
    %24 = vector.broadcast %23 : vector<2x1xf32> to vector<2x128xf32>
    %25 = arith.mulf %20, %24 : vector<2x128xf32>
    %26 = vector.shape_cast %25 : vector<2x128xf32> to vector<2x128x1xf32>
    %27 = vector.broadcast %26 : vector<2x128x1xf32> to vector<2x128x32xf32>
    %28 = arith.mulf %27, %1 : vector<2x128x32xf32>
    %cst_12 = arith.constant dense<0.000000e+00> : vector<2x32xf32>
    %29 = vector.multi_reduction <add>, %28, %cst_12 [1] : vector<2x128x32xf32> to vector<2x32xf32>
    %c0_13 = arith.constant 0 : index
    %c0_14 = arith.constant 0 : index
    %30 = vector.load %arg5[%c0_13, %c0_14] : memref<32x128xf32, #tpu.memory_space<vmem>>, vector<32x128xf32>
    %cst_15 = arith.constant dense<0.000000e+00> : vector<2x128xf32>
    %31 = tpu.matmul %0, %30, %cst_15 {dimension_numbers = #tpu.dot_dimension_numbers<[1], [0], [0], [1], [0, 0, 1, 1], [], []>} : vector<2x32xf32>, vector<32x128xf32>, vector<2x128xf32> -> vector<2x128xf32>
    %c0_16 = arith.constant 0 : index
    %c0_17 = arith.constant 0 : index
    %32 = vector.load %arg6[%c0_16, %c0_17] : memref<32x128xf32, #tpu.memory_space<vmem>>, vector<32x128xf32>
    %cst_18 = arith.constant dense<0.000000e+00> : vector<2x128xf32>
    %33 = tpu.matmul %29, %32, %cst_18 {dimension_numbers = #tpu.dot_dimension_numbers<[1], [0], [0], [1], [0, 0, 1, 1], [], []>} : vector<2x32xf32>, vector<32x128xf32>, vector<2x128xf32> -> vector<2x128xf32>
    %34 = arith.addf %31, %33 : vector<2x128xf32>
    %c0_19 = arith.constant 0 : index
    %c0_20 = arith.constant 0 : index
    %35 = vector.load %arg7[%c0_19, %c0_20] : memref<1x128xf32, #tpu.memory_space<vmem>>, vector<1x128xf32>
    %36 = vector.broadcast %35 : vector<1x128xf32> to vector<2x128xf32>
    %37 = arith.addf %34, %36 : vector<2x128xf32>
    %38 = math.tanh %37 : vector<2x128xf32>
    %c0_21 = arith.constant 0 : index
    %c0_22 = arith.constant 0 : index
    %39 = vector.load %arg8[%c0_21, %c0_22] : memref<2x128xf32, #tpu.memory_space<vmem>>, vector<2x128xf32>
    tpu.vector_store %arg8[%c0_21, %c0_22], %38 {strides = array<i32>} : memref<2x128xf32, #tpu.memory_space<vmem>>, vector<2x128xf32>,
    %c0_23 = arith.constant 0 : index
    %c0_24 = arith.constant 0 : index
    %40 = vector.load %arg9[%c0_23, %c0_24] : memref<2x128xf32, #tpu.memory_space<vmem>>, vector<2x128xf32>
    tpu.vector_store %arg9[%c0_23, %c0_24], %25 {strides = array<i32>} : memref<2x128xf32, #tpu.memory_space<vmem>>, vector<2x128xf32>,
    return
  }
  func.func @transform_0(%arg0: i32) -> (i32, i32) {
    %c0_i32 = arith.constant 0 : i32
    %c0_i32_0 = arith.constant 0 : i32
    return %arg0, %c0_i32 : i32, i32
  }
  func.func @transform_1(%arg0: i32) -> (i32, i32, i32) {
    %c0_i32 = arith.constant 0 : i32
    %c0_i32_0 = arith.constant 0 : i32
    %c0_i32_1 = arith.constant 0 : i32
    return %arg0, %c0_i32, %c0_i32_0 : i32, i32, i32
  }
  func.func @transform_2(%arg0: i32) -> (i32, i32) {
    %c0_i32 = arith.constant 0 : i32
    %c0_i32_0 = arith.constant 0 : i32
    %c0_i32_1 = arith.constant 0 : i32
    return %c0_i32, %c0_i32_0 : i32, i32
  }
  func.func @transform_3(%arg0: i32) -> (i32, i32) {
    %c0_i32 = arith.constant 0 : i32
    %c0_i32_0 = arith.constant 0 : i32
    %c0_i32_1 = arith.constant 0 : i32
    return %c0_i32, %c0_i32_0 : i32, i32
  }
  func.func @transform_4(%arg0: i32) -> (i32, i32) {
    %c0_i32 = arith.constant 0 : i32
    %c0_i32_0 = arith.constant 0 : i32
    %c0_i32_1 = arith.constant 0 : i32
    return %c0_i32, %c0_i32_0 : i32, i32
  }
  func.func @transform_5(%arg0: i32) -> (i32, i32) {
    %c0_i32 = arith.constant 0 : i32
    %c0_i32_0 = arith.constant 0 : i32
    %c0_i32_1 = arith.constant 0 : i32
    return %c0_i32, %c0_i32_0 : i32, i32
  }
  func.func @transform_6(%arg0: i32) -> (i32, i32) {
    %c0_i32 = arith.constant 0 : i32
    %c0_i32_0 = arith.constant 0 : i32
    %c0_i32_1 = arith.constant 0 : i32
    return %c0_i32, %c0_i32_0 : i32, i32
  }
  func.func @transform_7(%arg0: i32) -> (i32, i32) {
    %c0_i32 = arith.constant 0 : i32
    %c0_i32_0 = arith.constant 0 : i32
    return %arg0, %c0_i32 : i32, i32
  }
  func.func @transform_8(%arg0: i32) -> (i32, i32) {
    %c0_i32 = arith.constant 0 : i32
    %c0_i32_0 = arith.constant 0 : i32
    return %arg0, %c0_i32 : i32, i32
  }
}

</mosaic_0001>

<bundles_post_ra>
// kernel: tpu_custom_call.1
= control target key start
LH: loop header
LB: loop body
LE: loop exit
PB: predicated region body
PF: predicated region fallthrough
CT: control target
= control target key end

     0   :  { %14 = vsyncpa [#allocation3], 0  ;;  %s1981_s0 = inlined_call_operand.hbm [shape: f32[2,32], index: 0, kind: input, shape index: {}]   ;;  %s1982_s1 = inlined_call_operand.hbm [shape: f32[2,128,32], index: 1, kind: input, shape index: {}]   ;;  %s1983_s2 = inlined_call_operand.hbm [shape: f32[32,32], index: 2, kind: input, shape index: {}]   ;;  %s1984_s3 = inlined_call_operand.hbm [shape: f32[1,32], index: 3, kind: input, shape index: {}]   ;;  %s1985_s4 = inlined_call_operand.hbm [shape: f32[32,128], index: 4, kind: input, shape index: {}]   ;;  %s1986_s5 = inlined_call_operand.hbm [shape: f32[32,128], index: 5, kind: input, shape index: {}]   ;;  %s1987_s6 = inlined_call_operand.hbm [shape: f32[1,128], index: 6, kind: input, shape index: {}]   ;;  %s1988_s7 = inlined_call_operand.hbm [shape: f32[2,128], index: 7, kind: output, shape index: {0}]   ;;  %s1989_s8 = inlined_call_operand.hbm [shape: f32[2,128], index: 8, kind: output, shape index: {1}]  }
   0x1   :  { %15 = vsyncpa [#allocation6], 0 }
   0x2   :  { %16 = vsyncpa [#allocation9], 0 }
   0x3   :  { %17 = vsyncpa [#allocation12], 0 }
   0x4   :  { %18 = vsyncpa [#allocation4], 0 }
   0x5   :  { %19 = vsyncpa [#allocation16], 0  ;;  %s1375_s27 = smov [#allocation5]   ;;  %s1165_s9 = scalar_lea.hbm %s1982_s1, 4096 }
   0x6   :  { %s35_s28 = sshll.u32 %s1375_s27, 4  ;;  %p1166_p0 = scmp.ne.s32.totalorder %s1982_s1, %s1165_s9  ;;  %s36_s28 = int_to_ptr.vmem [resolvable:$true] %s35_s28 }
   0x7   :  { %p1169_p1 = scmp.lt.u32.totalorder %s1165_s9, %s1982_s1 }
   0x9   :  { %p1171_p2 = pnand %p1169_p1, %p1166_p0 }
   0xb   :  { %1174 = shalt.err (!%p1171_p2)
}
   0xc   :  { %s1175_s14 = scalar_lea.vmem %s36_s28, 4096  ;;  %p1180_p4 = scmp.lt.s32.totalorder %s36_s28, %s36_s28 }
   0xd   :  { %p1176_p3 = scmp.ne.s32.totalorder %s36_s28, %s1175_s14  ;;  %p1181_p5 = scmp.lt.s32.totalorder %s1175_s14, %s1175_s14 }
   0xf   :  { %p1182_p6 = por %p1181_p5, %p1180_p4 }
  0x11   :  { %p1183_p7 = pnand %p1182_p6, %p1176_p3 }
  0x13   :  { %1186 = shalt.err (!%p1183_p7)
}
  0x14   :  { %s1376_s15 = smov 128   ;;  %s1377_s16 = smov 8  }
  0x15   :  { %41 = dma.hbm_to_vmem [thread:$0]  %s1982_s1, 4096, %s36_s28, [#allocation6], %s1376_s15, %s1376_s15, %s1377_s16  }
  0x16   :  { %s1378_s19 = smov [#allocation8]   ;;  %s1379_s21 = smov [#allocation11]  }
  0x17   :  { %s60_s20 = sshll.u32 %s1378_s19, 4  ;;  %s81_s22 = sshll.u32 %s1379_s21, 4  ;;  %s61_s20 = int_to_ptr.vmem [resolvable:$true] %s60_s20  ;;  %s82_s22 = int_to_ptr.vmem [resolvable:$true] %s81_s22 }
  0x18   :  { %s1187_s25 = scalar_lea.hbm %s1984_s3, 16 }
  0x19   :  { %p1188_p8 = scmp.ne.s32.totalorder %s1984_s3, %s1187_s25  ;;  %p1191_p9 = scmp.lt.u32.totalorder %s1187_s25, %s1984_s3 }
  0x1b   :  { %p1193_p10 = pnand %p1191_p9, %p1188_p8 }
  0x1d   :  { %1196 = shalt.err (!%p1193_p10)
}
  0x1e   :  { %s1197_s1 = scalar_lea.vmem %s61_s20, 16  ;;  %s1201_s28 = scalar_lea.vmem %s61_s20, 32 }
  0x1f   :  { %p1198_p11 = scmp.ne.s32.totalorder %s61_s20, %s1197_s1  ;;  %p1202_p12 = scmp.lt.s32.totalorder %s61_s20, %s61_s20 }
  0x20   :  { %p1203_p13 = scmp.lt.s32.totalorder %s1201_s28, %s1197_s1 }
  0x22   :  { %p1204_p0 = por %p1203_p13, %p1202_p12 }
  0x24   :  { %p1205_p1 = pnand %p1204_p0, %p1198_p11 }
  0x26   :  { %1208 = shalt.err (!%p1205_p1)
}
  0x27   :  { %63 = dma.hbm_to_vmem [thread:$0]  %s1984_s3, 16, %s61_s20, [#allocation9]  }
  0x28   :  { %s1209_s13 = scalar_lea.hbm %s1986_s5, 512 }
  0x29   :  { %p1210_p2 = scmp.ne.s32.totalorder %s1986_s5, %s1209_s13  ;;  %p1213_p3 = scmp.lt.u32.totalorder %s1209_s13, %s1986_s5 }
  0x2b   :  { %p1215_p4 = pnand %p1213_p3, %p1210_p2 }
  0x2d   :  { %1218 = shalt.err (!%p1215_p4)
}
  0x2e   :  { %s1219_s21 = scalar_lea.vmem %s82_s22, 512  ;;  %p1224_p6 = scmp.lt.s32.totalorder %s82_s22, %s82_s22 }
  0x2f   :  { %p1220_p5 = scmp.ne.s32.totalorder %s82_s22, %s1219_s21  ;;  %p1225_p7 = scmp.lt.s32.totalorder %s1219_s21, %s1219_s21 }
  0x31   :  { %p1226_p8 = por %p1225_p7, %p1224_p6 }
  0x33   :  { %p1227_p9 = pnand %p1226_p8, %p1220_p5 }
  0x35   :  { %1230 = shalt.err (!%p1227_p9)
}
  0x36   :  { %87 = dma.hbm_to_vmem [thread:$0]  %s1986_s5, 512, %s82_s22, [#allocation12], %s1376_s15, %s1376_s15, %s1377_s16  }
  0x37   :  { %s1380_s23 = smov [#allocation2]   ;;  %s1381_s25 = smov [#allocation7]  }
  0x38   :  { %s26_s24 = sshll.u32 %s1380_s23, 4  ;;  %s47_s26 = sshll.u32 %s1381_s25, 4  ;;  %s27_s24 = int_to_ptr.vmem [resolvable:$true] %s26_s24  ;;  %s48_s26 = int_to_ptr.vmem [resolvable:$true] %s47_s26 }
  0x39   :  { %s1231_s30 = scalar_lea.hbm %s1981_s0, 32 }
  0x3a   :  { %p1232_p10 = scmp.ne.s32.totalorder %s1981_s0, %s1231_s30  ;;  %p1235_p11 = scmp.lt.u32.totalorder %s1231_s30, %s1981_s0 }
  0x3c   :  { %p1237_p12 = pnand %p1235_p11, %p1232_p10 }
  0x3e   :  { %1240 = shalt.err (!%p1237_p12)
}
  0x3f   :  { %s1241_s5 = scalar_lea.vmem %s27_s24, 32  ;;  %p1246_p0 = scmp.lt.s32.totalorder %s27_s24, %s27_s24 }
  0x40   :  { %p1242_p13 = scmp.ne.s32.totalorder %s27_s24, %s1241_s5  ;;  %p1247_p1 = scmp.lt.s32.totalorder %s1241_s5, %s1241_s5 }
  0x42   :  { %p1248_p2 = por %p1247_p1, %p1246_p0 }
  0x44   :  { %p1249_p3 = pnand %p1248_p2, %p1242_p13 }
  0x46   :  { %1252 = shalt.err (!%p1249_p3)
}
  0x47   :  { %29 = dma.hbm_to_vmem [thread:$0]  %s1981_s0, 32, %s27_s24, [#allocation3]  }
  0x48   :  { %s1253_s14 = scalar_lea.hbm %s1983_s2, 512 }
  0x49   :  { %p1254_p4 = scmp.ne.s32.totalorder %s1983_s2, %s1253_s14  ;;  %p1257_p5 = scmp.lt.u32.totalorder %s1253_s14, %s1983_s2 }
  0x4b   :  { %p1259_p6 = pnand %p1257_p5, %p1254_p4 }
  0x4d   :  { %1262 = shalt.err (!%p1259_p6)
}
  0x4e   :  { %s1263_s3 = scalar_lea.vmem %s48_s26, 512  ;;  %p1268_p8 = scmp.lt.s32.totalorder %s48_s26, %s48_s26 }
  0x4f   :  { %p1264_p7 = scmp.ne.s32.totalorder %s48_s26, %s1263_s3  ;;  %p1269_p9 = scmp.lt.s32.totalorder %s1263_s3, %s1263_s3 }
  0x51   :  { %p1270_p10 = por %p1269_p9, %p1268_p8 }
  0x53   :  { %p1271_p11 = pnand %p1270_p10, %p1264_p7 }
  0x55   :  { %1274 = shalt.err (!%p1271_p11)
}
  0x56   :  { %53 = dma.hbm_to_vmem [thread:$0]  %s1983_s2, 512, %s48_s26, [#allocation6], %s1376_s15, %s1376_s15, %s1377_s16  }
  0x57   :  { %s1382_s23 = smov [#allocation10]   ;;  %s1383_s25 = smov [#allocation13]  }
  0x58   :  { %s69_s24 = sshll.u32 %s1382_s23, 4  ;;  %s94_s27 = sshll.u32 %s1383_s25, 4  ;;  %s70_s24 = int_to_ptr.vmem [resolvable:$true] %s69_s24  ;;  %s95_s27 = int_to_ptr.vmem [resolvable:$true] %s94_s27 }
  0x59   :  { %s1275_s1 = scalar_lea.hbm %s1985_s4, 512 }
  0x5a   :  { %p1276_p12 = scmp.ne.s32.totalorder %s1985_s4, %s1275_s1  ;;  %p1279_p13 = scmp.lt.u32.totalorder %s1275_s1, %s1985_s4 }
  0x5c   :  { %p1281_p0 = pnand %p1279_p13, %p1276_p12 }
  0x5e   :  { %1284 = shalt.err (!%p1281_p0)
}
  0x5f   :  { %s1285_s2 = scalar_lea.vmem %s70_s24, 512  ;;  %p1290_p2 = scmp.lt.s32.totalorder %s70_s24, %s70_s24 }
  0x60   :  { %p1286_p1 = scmp.ne.s32.totalorder %s70_s24, %s1285_s2  ;;  %p1291_p3 = scmp.lt.s32.totalorder %s1285_s2, %s1285_s2 }
  0x62   :  { %p1292_p4 = por %p1291_p3, %p1290_p2 }
  0x64   :  { %p1293_p5 = pnand %p1292_p4, %p1286_p1 }
  0x66   :  { %1296 = shalt.err (!%p1293_p5)
}
  0x67   :  { %75 = dma.hbm_to_vmem [thread:$0]  %s1985_s4, 512, %s70_s24, [#allocation9], %s1376_s15, %s1376_s15, %s1377_s16  }
  0x68   :  { %s1297_s13 = scalar_lea.hbm %s1987_s6, 16 }
  0x69   :  { %p1298_p6 = scmp.ne.s32.totalorder %s1987_s6, %s1297_s13  ;;  %p1301_p7 = scmp.lt.u32.totalorder %s1297_s13, %s1987_s6 }
  0x6b   :  { %p1303_p8 = pnand %p1301_p7, %p1298_p6 }
  0x6d   :  { %1306 = shalt.err (!%p1303_p8)
}
  0x6e   :  { %s1307_s21 = scalar_lea.vmem %s95_s27, 16  ;;  %s1311_s3 = scalar_lea.vmem %s95_s27, 32 }
  0x6f   :  { %p1308_p9 = scmp.ne.s32.totalorder %s95_s27, %s1307_s21  ;;  %p1312_p10 = scmp.lt.s32.totalorder %s95_s27, %s95_s27 }
  0x70   :  { %p1313_p11 = scmp.lt.s32.totalorder %s1311_s3, %s1307_s21 }
  0x72   :  { %p1314_p12 = por %p1313_p11, %p1312_p10 }
  0x74   :  { %p1315_p13 = pnand %p1314_p12, %p1308_p9 }
  0x76   :  { %1318 = shalt.err (!%p1315_p13)
}
  0x77   :  { %97 = dma.hbm_to_vmem [thread:$0]  %s1987_s6, 16, %s95_s27, [#allocation12]  }
  0x78   :  { %1363 = dma.done.wait [#allocation3], 32  }
  0x79   :  { %1364 = vsyncadd [#allocation3], 4294967264 }
  0x7a   :  { %1365 = dma.done.wait [#allocation6], 4608  }
  0x7b   :  { %1366 = vsyncadd [#allocation6], 4294962688 }
  0x7c   :  { %1367 = dma.done.wait [#allocation9], 528  }
  0x7d   :  { %1368 = vsyncadd [#allocation9], 4294966768 }
  0x7e   :  { %1369 = dma.done.wait [#allocation12], 528  }
  0x7f   :  { %1370 = vsyncadd [#allocation12], 4294966768  ;;  %v1990_v0 = vmov 0.0|0.0   ;;  %vm1385_vm0 = vmmov 0   ;;  %v1386_v1 = vmov 0.0   ;;  %v152_v2 = vld [vmem:[#allocation7] sm:$0xff]  ;;  %v241_v11 = vlaneseq }
  0x80   :  { %1126 = vmatprep.subr.bf16.mxu0 %v1990_v0  ;;  %1101 = vmatprep.mubr.msk.f32.mxu0 %vm1385_vm0, %v1386_v1  ;;  %v153_v3 = vld [vmem:[#allocation7 + $0x8] sm:$0xff]  ;;  %v154_v4 = vld [vmem:[#allocation7 + $0x10] sm:$0xff]  ;;  %v155_v6 = vld [vmem:[#allocation7 + $0x18] sm:$0xff]  ;;  %vm163_vm1 = vcmask 261120   ;;  %v1387_v9 = vmov 1966171168  }
  0x81   :  { %1132 = vmatprep.subr.bf16.mxu1 %v1990_v0  ;;  %1112 = vmatprep.mubr.msk.f32.mxu1 %vm1385_vm0, %v1386_v1  ;;  %v1127_v5 = vpack.c.bf16 %v153_v3, %v152_v2  ;;  %v1130_v7 = vpack.c.bf16 %v155_v6, %v154_v4  ;;  %v1536_v8 = vld [vmem:[#allocation2] sm:$0x3]  ;;  %v239_v10 = vunpack.c.l.s4 %v1387_v9  ;;  %v1543_v13 = vshrl.u32 %v241_v11, 7  ;;  %v1073_v14 = vld [vmem:[#allocation8] ss:$0 sm:$0xff]  ;;  %v1556_v27 = vld [vmem:[#allocation5 + $0x8] sm:$0xff] }
  0x82   :  { %v1549_v23 = vld [vmem:[#allocation5] sm:$0xff]  ;;  %v1563_v30 = vld [vmem:[#allocation5 + $0x88] sm:$0xff]  ;;  %v1570_v34 = vld [vmem:[#allocation5 + $0x10] sm:$0xff]  ;;  %vm442_vm2 = vcmask 130112   ;;  %vm449_vm3 = vcmask 195712   ;;  %vm456_vm4 = vcmask 261312  }
  0x83   :  { %1128 = vmatpush3.bf16.msra.mxu0 %v1127_v5  ;;  %v240_v12 = vunpack.c.0.s8 %v239_v10  ;;  %v1547_v20 = vsub.s32 0, %v1543_v13  ;;  %v1554_v26 = vld [vmem:[#allocation5 + $0x80] sm:$0xff]  ;;  %v1575_v37 = vld [vmem:[#allocation5 + $0x90] sm:$0xff]  ;;  %v1580_v40 = vld [vmem:[#allocation5 + $0x18] sm:$0xff]  ;;  %vm463_vm5 = vcmask 326912   ;;  %vm470_vm6 = vcmask 392512  }
  0x84   :  { %1129 = vmatprep.subr.bf16.mxu0 %v1990_v0  ;;  %v1585_v43 = vld [vmem:[#allocation5 + $0x98] sm:$0xff]  ;;  %v1590_v46 = vld [vmem:[#allocation5 + $0x20] sm:$0xff]  ;;  %v1600_v52 = vld [vmem:[#allocation5 + $0x28] sm:$0xff]  ;;  %vm477_vm7 = vcmask 458112   ;;  %vm484_vm8 = vcmask 523712   ;;  %vm491_vm9 = vcmask 589312  }
  0x85   :  { %v243_v15 = vsub.s32 %v240_v12, %v1543_v13  ;;  %v1595_v49 = vld [vmem:[#allocation5 + $0xa0] sm:$0xff]  ;;  %v1605_v55 = vld [vmem:[#allocation5 + $0xa8] sm:$0xff]  ;;  %v1610_v58 = vld [vmem:[#allocation5 + $0x30] sm:$0xff]  ;;  %vm498_vm10 = vcmask 654912   ;;  %vm505_vm11 = vcmask 720512   ;;  %vm512_vm12 = vcmask 786112  }
  0x86   :  { %2012 = vst [vmem:[#allocation23_spill] sm:$0xff] %v1595_v49  ;;  %2013 = vst [vmem:[#allocation24_spill] sm:$0xff] %v1605_v55  ;;  %v1615_v61 = vld [vmem:[#allocation5 + $0xb0] sm:$0xff]  ;;  %v1625_v4 = vld [vmem:[#allocation5 + $0xb8] sm:$0xff]  ;;  %vm519_vm13 = vcmask 851712   ;;  %vm526_vm14 = vcmask 917312  }
  0x87   :  { %1131 = vmatpush3.bf16.msra.mxu0 %v1130_v7  ;;  %2014 = vst [vmem:[#allocation25_spill] sm:$0xff] %v1615_v61  ;;  %2015 = vst [vmem:[#allocation26_spill] sm:$0xff] %v1625_v4  ;;  %v1630_v7 = vld [vmem:[#allocation5 + $0x40] sm:$0xff]  ;;  %vm533_vm15 = vcmask 982912   ;;  %s1388_s6 = smov [#allocation15]  }
  0x88   :  { %1138 = vmatprep.subr.bf16.mxu0 %v1990_v0  ;;  %2016 = vst [vmem:[#allocation27_spill] sm:$0xff] %v1630_v7  ;;  %v1635_v12 = vld [vmem:[#allocation5 + $0xc0] sm:$0xff]  ;;  %s1057_s16 = sshll.u32 %s1388_s6, 4  ;;  %s1058_s16 = int_to_ptr.vmem [resolvable:$true] %s1057_s16 }
  0x89   :  { %2017 = vst [vmem:[#allocation28_spill] sm:$0xff] %v1635_v12  ;;  %s1319_s0 = scalar_lea.vmem %s1058_s16, 32  ;;  %p1324_p1 = scmp.lt.s32.totalorder %s1058_s16, %s1058_s16 }
  0x8a   :  { %1102 = vmatmul.mubr.msk.f32.vlgmr.msra.gmra.mrb[0].mxu0 %vm163_vm1, %v1536_v8  ;;  %p1320_p0 = scmp.ne.s32.totalorder %s1058_s16, %s1319_s0  ;;  %p1325_p2 = scmp.lt.s32.totalorder %s1319_s0, %s1319_s0 }
  0x8b   :  { %1123 = vmatprep.mubr.msk.f32.mxu0 %vm1385_vm0, %v1386_v1  ;;  %v1620_v1 = vld [vmem:[#allocation5 + $0x38] sm:$0xff]  ;;  %vm540_vm0 = vcmask 1048512  }
  0x8c   :  { %p1326_p3 = por %p1325_p2, %p1324_p1 }
  0x8e   :  { %p1327_p4 = pnand %p1326_p3, %p1320_p0 }
 0x15d   :  { %v233_v16 = vpop.f32.mrb[0].mxu0 }
 0x15e   :  { %v234_v17 = vadd.f32 %v1073_v14, %v233_v16  ;;  %v1103_v18 = vpop.f32.mrb[1].mxu0  ;;  %v1640_v16 = vld [vmem:[#allocation5 + $0x48] sm:$0xff] }
 0x15f   :  { %2018 = vst [vmem:[#allocation29_spill] sm:$0xff] %v1640_v16 }
 0x160   :  { %v244_v19 = vrot.slane %v234_v17, %v243_v15 }
 0x162   :  { %v245_v21 = vcombine.high %v244_v19, %v244_v19  ;;  %v252_v22 = vrot.slane %v244_v19, %v243_v15  ;;  %v1645_v19 = vld [vmem:[#allocation5 + $0xc8] sm:$0xff] }
 0x163   :  { %2019 = vst [vmem:[#allocation30_spill] sm:$0xff] %v1645_v19 }
 0x164   :  { %v259_v24 = vrot.slane %v245_v21, %v243_v15  ;;  %v1552_v25 = vrot.slane %v252_v22, %v1547_v20 }
 0x166   :  { %v1559_v28 = vrot.slane %v259_v24, %v1547_v20  ;;  %v270_v29 = vmul.f32 %v1552_v25, %v1549_v23  ;;  %v271_v33 = vmul.f32 %v1552_v25, %v1556_v27  ;;  %v272_v39 = vmul.f32 %v1552_v25, %v1570_v34  ;;  %v1650_v24 = vld [vmem:[#allocation5 + $0x50] sm:$0xff] }
 0x167   :  { %v273_v45 = vmul.f32 %v1552_v25, %v1580_v40  ;;  %v274_v51 = vmul.f32 %v1552_v25, %v1590_v46  ;;  %v275_v57 = vmul.f32 %v1552_v25, %v1600_v52  ;;  %v276_v63 = vmul.f32 %v1552_v25, %v1610_v58  ;;  %2020 = vst [vmem:[#allocation31_spill] sm:$0xff] %v1650_v24 }
 0x168   :  { %v302_v31 = vsel %vm163_vm1, %v270_v29, 0.0  ;;  %v286_v32 = vmul.f32 %v1559_v28, %v1554_v26  ;;  %v287_v36 = vmul.f32 %v1559_v28, %v1563_v30  ;;  %v305_v38 = vsel %vm163_vm1, %v271_v33, 0.0 }
 0x169   :  { %303 = vadd.xlane.f32.xlu0 %v302_v31  ;;  %v288_v42 = vmul.f32 %v1559_v28, %v1575_v37  ;;  %v308_v44 = vsel %vm163_vm1, %v272_v39, 0.0  ;;  %v289_v48 = vmul.f32 %v1559_v28, %v1585_v43  ;;  %v311_v50 = vsel %vm163_vm1, %v273_v45, 0.0  ;;  %v1670_v45 = vld [vmem:[#allocation5 + $0x60] sm:$0xff] }
 0x16a   :  { %v350_v35 = vsel %vm163_vm1, %v286_v32, 0.0  ;;  %v353_v41 = vsel %vm163_vm1, %v287_v36, 0.0  ;;  %v290_v54 = vmul.f32 %v1559_v28, %v1595_v49  ;;  %v314_v56 = vsel %vm163_vm1, %v274_v51, 0.0  ;;  %v1655_v32 = vld [vmem:[#allocation5 + $0xd0] sm:$0xff]  ;;  %v1660_v36 = vld [vmem:[#allocation5 + $0x58] sm:$0xff]  ;;  %2024 = vst [vmem:[#allocation35_spill] sm:$0xff] %v1670_v45 }
 0x16b   :  { %351 = vadd.xlane.f32.xlu1 %v350_v35  ;;  %v356_v47 = vsel %vm163_vm1, %v288_v42, 0.0  ;;  %v359_v53 = vsel %vm163_vm1, %v289_v48, 0.0  ;;  %v291_v60 = vmul.f32 %v1559_v28, %v1605_v55  ;;  %v317_v62 = vsel %vm163_vm1, %v275_v57, 0.0  ;;  %2021 = vst [vmem:[#allocation32_spill] sm:$0xff] %v1655_v32  ;;  %2022 = vst [vmem:[#allocation33_spill] sm:$0xff] %v1660_v36 }
 0x16c   :  { %v362_v59 = vsel %vm163_vm1, %v290_v54, 0.0  ;;  %v292_v3 = vmul.f32 %v1559_v28, %v1615_v61  ;;  %v320_v5 = vsel %vm163_vm1, %v276_v63, 0.0  ;;  %v277_v6 = vmul.f32 %v1552_v25, %v1620_v1  ;;  %v1680_v54 = vld [vmem:[#allocation5 + $0x68] sm:$0xff]  ;;  %v1690_v63 = vld [vmem:[#allocation5 + $0x70] sm:$0xff] }
 0x16d   :  { %306 = vadd.xlane.f32.xlu0 %v305_v38  ;;  %v365_v2 = vsel %vm163_vm1, %v291_v60, 0.0  ;;  %v293_v10 = vmul.f32 %v1559_v28, %v1625_v4  ;;  %v278_v15 = vmul.f32 %v1552_v25, %v1630_v7  ;;  %v294_v18 = vmul.f32 %v1559_v28, %v1635_v12  ;;  %2026 = vst [vmem:[#allocation37_spill] sm:$0xff] %v1680_v54 }
 0x16e   :  { %v368_v9 = vsel %vm163_vm1, %v292_v3, 0.0  ;;  %v323_v14 = vsel %vm163_vm1, %v277_v6, 0.0  ;;  %v279_v22 = vmul.f32 %v1552_v25, %v1640_v16  ;;  %v295_v31 = vmul.f32 %v1559_v28, %v1645_v19  ;;  %2028 = vst [vmem:[#allocation39_spill] sm:$0xff] %v1690_v63 }
 0x16f   :  { %354 = vadd.xlane.f32.xlu1 %v353_v41  ;;  %v371_v17 = vsel %vm163_vm1, %v293_v10, 0.0  ;;  %v326_v21 = vsel %vm163_vm1, %v278_v15, 0.0  ;;  %v374_v29 = vsel %vm163_vm1, %v294_v18, 0.0  ;;  %v280_v35 = vmul.f32 %v1552_v25, %v1650_v24  ;;  %v1665_v41 = vld [vmem:[#allocation5 + $0xd8] sm:$0xff] }
 0x170   :  { %v329_v33 = vsel %vm163_vm1, %v279_v22, 0.0  ;;  %v377_v38 = vsel %vm163_vm1, %v295_v31, 0.0  ;;  %v296_v39 = vmul.f32 %v1559_v28, %v1655_v32  ;;  %2023 = vst [vmem:[#allocation34_spill] sm:$0xff] %v1665_v41  ;;  %v297_v48 = vmul.f32 %v1559_v28, %v1665_v41  ;;  %v1700_v10 = vld [vmem:[#allocation5 + $0x78] sm:$0xff] }
 0x171   :  { %309 = vadd.xlane.f32.xlu0 %v308_v44  ;;  %v332_v42 = vsel %vm163_vm1, %v280_v35, 0.0  ;;  %v281_v44 = vmul.f32 %v1552_v25, %v1660_v36  ;;  %2030 = vst [vmem:[#allocation41_spill] sm:$0xff] %v1700_v10 }
 0x173   :  { %357 = vadd.xlane.f32.xlu1 %v356_v47  ;;  %v380_v47 = vsel %vm163_vm1, %v296_v39, 0.0  ;;  %v335_v51 = vsel %vm163_vm1, %v281_v44, 0.0 }
 0x175   :  { %312 = vadd.xlane.f32.xlu0 %v311_v50  ;;  %v1675_v50 = vld [vmem:[#allocation5 + $0xe0] sm:$0xff] }
 0x176   :  { %2025 = vst [vmem:[#allocation36_spill] sm:$0xff] %v1675_v50  ;;  %v298_v57 = vmul.f32 %v1559_v28, %v1675_v50 }
 0x177   :  { %360 = vadd.xlane.f32.xlu1 %v359_v53  ;;  %v282_v53 = vmul.f32 %v1552_v25, %v1670_v45 }
 0x179   :  { %315 = vadd.xlane.f32.xlu0 %v314_v56  ;;  %v383_v56 = vsel %vm163_vm1, %v297_v48, 0.0  ;;  %v338_v60 = vsel %vm163_vm1, %v282_v53, 0.0 }
 0x17b   :  { %363 = vadd.xlane.f32.xlu1 %v362_v59  ;;  %v1685_v59 = vld [vmem:[#allocation5 + $0xe8] sm:$0xff] }
 0x17c   :  { %2027 = vst [vmem:[#allocation38_spill] sm:$0xff] %v1685_v59  ;;  %v299_v3 = vmul.f32 %v1559_v28, %v1685_v59 }
 0x17d   :  { %318 = vadd.xlane.f32.xlu0 %v317_v62  ;;  %v283_v62 = vmul.f32 %v1552_v25, %v1680_v54 }
 0x17f   :  { %366 = vadd.xlane.f32.xlu1 %v365_v2  ;;  %v386_v2 = vsel %vm163_vm1, %v298_v57, 0.0  ;;  %v341_v6 = vsel %vm163_vm1, %v283_v62, 0.0 }
 0x181   :  { %321 = vadd.xlane.f32.xlu0 %v320_v5  ;;  %v1695_v5 = vld [vmem:[#allocation5 + $0xf0] sm:$0xff] }
 0x182   :  { %2029 = vst [vmem:[#allocation40_spill] sm:$0xff] %v1695_v5  ;;  %v300_v15 = vmul.f32 %v1559_v28, %v1695_v5 }
 0x183   :  { %369 = vadd.xlane.f32.xlu1 %v368_v9  ;;  %v284_v9 = vmul.f32 %v1552_v25, %v1690_v63 }
 0x184   :  { %v392_v22 = vsel %vm163_vm1, %v300_v15, 0.0 }
 0x185   :  { %324 = vadd.xlane.f32.xlu0 %v323_v14  ;;  %v389_v14 = vsel %vm163_vm1, %v299_v3, 0.0  ;;  %v344_v18 = vsel %vm163_vm1, %v284_v9, 0.0 }
 0x187   :  { %372 = vadd.xlane.f32.xlu1 %v371_v17  ;;  %v1705_v17 = vld [vmem:[#allocation5 + $0xf8] sm:$0xff] }
 0x188   :  { %2031 = vst [vmem:[#allocation42_spill] sm:$0xff] %v1705_v17 }
 0x189   :  { %327 = vadd.xlane.f32.xlu0 %v326_v21  ;;  %v285_v21 = vmul.f32 %v1552_v25, %v1700_v10 }
 0x18b   :  { %375 = vadd.xlane.f32.xlu1 %v374_v29  ;;  %v301_v29 = vmul.f32 %v1559_v28, %v1705_v17  ;;  %v347_v31 = vsel %vm163_vm1, %v285_v21, 0.0 }
 0x18d   :  { %330 = vadd.xlane.f32.xlu0 %v329_v33  ;;  %v395_v33 = vsel %vm163_vm1, %v301_v29, 0.0 }
 0x18f   :  { %378 = vadd.xlane.f32.xlu1 %v377_v38 }
 0x191   :  { %333 = vadd.xlane.f32.xlu0 %v332_v42 }
 0x193   :  { %381 = vadd.xlane.f32.xlu1 %v380_v47 }
 0x195   :  { %336 = vadd.xlane.f32.xlu0 %v335_v51 }
 0x197   :  { %384 = vadd.xlane.f32.xlu1 %v383_v56 }
 0x199   :  { %339 = vadd.xlane.f32.xlu0 %v338_v60 }
 0x19b   :  { %387 = vadd.xlane.f32.xlu1 %v386_v2 }
 0x19d   :  { %342 = vadd.xlane.f32.xlu0 %v341_v6  ;;  %v1750_v6 = vand.u32 127, %v241_v11 }
 0x19f   :  { %390 = vadd.xlane.f32.xlu1 %v389_v14  ;;  %v437_v14 = vadd.s32 4294967288, %v1750_v6  ;;  %v435_v29 = vsub.s32 %v1750_v6, %v1543_v13  ;;  %v458_v11 = vadd.s32 4294967264, %v1750_v6  ;;  %v465_v0 = vadd.s32 4294967256, %v1750_v6 }
 0x1a0   :  { %v472_v17 = vadd.s32 4294967248, %v1750_v6  ;;  %v479_v5 = vadd.s32 4294967240, %v1750_v6  ;;  %v486_v59 = vadd.s32 4294967232, %v1750_v6  ;;  %v493_v50 = vadd.s32 4294967224, %v1750_v6 }
 0x1a1   :  { %345 = vadd.xlane.f32.xlu0 %v344_v18  ;;  %v444_v18 = vadd.s32 4294967280, %v1750_v6  ;;  %v500_v41 = vadd.s32 4294967216, %v1750_v6  ;;  %v507_v32 = vadd.s32 4294967208, %v1750_v6  ;;  %v461_v54 = vsub.s32 %v458_v11, %v1543_v13 }
 0x1a2   :  { %v521_v45 = vadd.s32 4294967192, %v1750_v6  ;;  %v468_v12 = vsub.s32 %v465_v0, %v1543_v13  ;;  %v475_v36 = vsub.s32 %v472_v17, %v1543_v13  ;;  %v1787_v4 = vsub.s32 %v486_v59, %v1543_v13 }
 0x1a3   :  { %393 = vadd.xlane.f32.xlu1 %v392_v22  ;;  %v451_v22 = vadd.s32 4294967272, %v1750_v6  ;;  %v447_v10 = vsub.s32 %v444_v18, %v1543_v13  ;;  %v514_v18 = vadd.s32 4294967200, %v1750_v6  ;;  %v1790_v11 = vsub.s32 %v493_v50, %v1543_v13 }
 0x1a4   :  { %v528_v61 = vadd.s32 4294967184, %v1750_v6  ;;  %v535_v16 = vadd.s32 4294967176, %v1750_v6  ;;  %v1802_v59 = vsub.s32 %v507_v32, %v1543_v13 }
 0x1a5   :  { %348 = vadd.xlane.f32.xlu0 %v347_v31  ;;  %v440_v31 = vsub.s32 %v437_v14, %v1543_v13  ;;  %v454_v63 = vsub.s32 %v451_v22, %v1543_v13  ;;  %v482_v22 = vsub.s32 %v479_v5, %v1543_v13  ;;  %v1799_v5 = vsub.s32 %v500_v41, %v1543_v13 }
 0x1a6   :  { %v1807_v7 = vsub.s32 %v514_v18, %v1543_v13  ;;  %v1821_v18 = vsub.s32 %v528_v61, %v1543_v13 }
 0x1a7   :  { %396 = vadd.xlane.f32.xlu1 %v395_v33 }
 0x1f6   :  { %v1715_v35 = vpop.xlane.xlu0 %303 }
 0x1f8   :  { %v1717_v38 = vpop.xlane.xlu1 %351 }
 0x1f9   :  { %v545_v41 = vrot.slane %v1717_v38, %v435_v29 }
 0x1fa   :  { %v1719_v39 = vpop.xlane.xlu0 %306 }
 0x1fb   :  { %v441_v0 = vrot.slane %v1719_v39, %v440_v31  ;;  %v1812_v39 = vsub.s32 %v521_v45, %v1543_v13  ;;  %v1824_v45 = vsub.s32 %v535_v16, %v1543_v13 }
 0x1fc   :  { %v1721_v25 = vpop.xlane.xlu1 %354 }
 0x1fd   :  { %v549_v17 = vrot.slane %v1721_v25, %v440_v31  ;;  %v436_v25 = vrot.slane %v1715_v35, %v435_v29 }
 0x1fe   :  { %v1723_v42 = vpop.xlane.xlu0 %309 }
 0x1ff   :  { %v448_v50 = vrot.slane %v1723_v42, %v447_v10  ;;  %v443_v35 = vsel %vm442_vm2, %v441_v0, %v436_v25  ;;  %v550_v38 = vsel %vm442_vm2, %v549_v17, %v545_v41  ;;  %vm621_vm2 = vcmask 1041409  }
 0x200   :  { %v1725_v44 = vpop.xlane.xlu1 %357 }
 0x201   :  { %v554_v55 = vrot.slane %v1725_v44, %v447_v10 }
 0x202   :  { %v1727_v28 = vpop.xlane.xlu0 %312 }
 0x203   :  { %v455_v32 = vrot.slane %v1727_v28, %v454_v63 }
 0x204   :  { %v1729_v47 = vpop.xlane.xlu1 %360 }
 0x205   :  { %v559_v31 = vrot.slane %v1729_v47, %v454_v63  ;;  %v450_v47 = vsel %vm449_vm3, %v448_v50, %v443_v35 }
 0x206   :  { %v1731_v48 = vpop.xlane.xlu0 %315 }
 0x207   :  { %v462_v10 = vrot.slane %v1731_v48, %v461_v54 }
 0x208   :  { %v1733_v51 = vpop.xlane.xlu1 %363 }
 0x209   :  { %v564_v42 = vrot.slane %v1733_v51, %v461_v54  ;;  %v555_v54 = vsel %vm449_vm3, %v554_v55, %v550_v38  ;;  %v457_v51 = vsel %vm456_vm4, %v455_v32, %v450_v47  ;;  %vm400_vm3 = vcmp.lt.s32.totalorder %v1750_v6, 8 }
 0x20a   :  { %v1735_v53 = vpop.xlane.xlu0 %318  ;;  %v560_v29 = vsel %vm456_vm4, %v559_v31, %v555_v54  ;;  %vm625_vm4 = vcmask 1041408   ;;  %v706_v6 = vsub.s32 1, %v1543_v13  ;;  %v877_v13 = vld [vmem:[#allocation10] sm:$0xff] }
 0x20b   :  { %v469_v28 = vrot.slane %v1735_v53, %v468_v12 }
 0x20c   :  { %v1737_v56 = vpop.xlane.xlu1 %366 }
 0x20d   :  { %v569_v63 = vrot.slane %v1737_v56, %v468_v12  ;;  %v464_v12 = vsel %vm463_vm5, %v462_v10, %v457_v51  ;;  %v565_v56 = vsel %vm463_vm5, %v564_v42, %v560_v29 }
 0x20e   :  { %v1739_v57 = vpop.xlane.xlu0 %321 }
 0x20f   :  { %v476_v48 = vrot.slane %v1739_v57, %v475_v36  ;;  %v570_v17 = vsel %vm470_vm6, %v569_v63, %v565_v56 }
 0x210   :  { %v1741_v60 = vpop.xlane.xlu1 %369 }
 0x211   :  { %v574_v61 = vrot.slane %v1741_v60, %v475_v36  ;;  %v471_v60 = vsel %vm470_vm6, %v469_v28, %v464_v12 }
 0x212   :  { %v1743_v62 = vpop.xlane.xlu0 %324 }
 0x213   :  { %v483_v0 = vrot.slane %v1743_v62, %v482_v22  ;;  %v575_v50 = vsel %vm477_vm7, %v574_v61, %v570_v17 }
 0x214   :  { %v1745_v2 = vpop.xlane.xlu1 %372 }
 0x215   :  { %v579_v53 = vrot.slane %v1745_v2, %v482_v22  ;;  %v478_v22 = vsel %vm477_vm7, %v476_v48, %v471_v60 }
 0x216   :  { %v1747_v3 = vpop.xlane.xlu0 %327  ;;  %v485_v25 = vsel %vm484_vm8, %v483_v0, %v478_v22 }
 0x217   :  { %v490_v55 = vrot.slane %v1747_v3, %v1787_v4  ;;  %v580_v41 = vsel %vm484_vm8, %v579_v53, %v575_v50  ;;  %v881_v50 = vld [vmem:[#allocation11] sm:$0xff] }
 0x218   :  { %v1752_v9 = vpop.xlane.xlu1 %375 }
 0x219   :  { %v584_v36 = vrot.slane %v1752_v9, %v1787_v4 }
 0x21a   :  { %v1755_v15 = vpop.xlane.xlu0 %330 }
 0x21b   :  { %v497_v62 = vrot.slane %v1755_v15, %v1790_v11  ;;  %v585_v32 = vsel %vm491_vm9, %v584_v36, %v580_v41 }
 0x21c   :  { %v1758_v21 = vpop.xlane.xlu1 %378 }
 0x21d   :  { %v589_v2 = vrot.slane %v1758_v21, %v1790_v11  ;;  %v492_v11 = vsel %vm491_vm9, %v490_v55, %v485_v25  ;;  %v880_v25 = vld [vmem:[#allocation10 + $0x18] sm:$0xff] }
 0x21e   :  { %v1765_v33 = vpop.xlane.xlu0 %333  ;;  %v499_v31 = vsel %vm498_vm10, %v497_v62, %v492_v11 }
 0x21f   :  { %v504_v3 = vrot.slane %v1765_v33, %v1799_v5  ;;  %v590_v10 = vsel %vm498_vm10, %v589_v2, %v585_v32  ;;  %v2032_v32 = vmov 0.0|0.0  }
 0x220   :  { %v1773_v14 = vpop.xlane.xlu1 %381 }
 0x221   :  { %v594_v4 = vrot.slane %v1773_v14, %v1799_v5 }
 0x222   :  { %v1779_v19 = vpop.xlane.xlu0 %336 }
 0x223   :  { %v511_v15 = vrot.slane %v1779_v19, %v1802_v59 }
 0x224   :  { %v1792_v24 = vpop.xlane.xlu1 %384 }
 0x225   :  { %v599_v21 = vrot.slane %v1792_v24, %v1802_v59  ;;  %v506_v24 = vsel %vm505_vm11, %v504_v3, %v499_v31  ;;  %v595_v59 = vsel %vm505_vm11, %v594_v4, %v590_v10  ;;  %v882_v4 = vld [vmem:[#allocation11 + $0x8] sm:$0xff] }
 0x226   :  { %v1809_v49 = vpop.xlane.xlu0 %339  ;;  %v1133_v41 = vpack.c.bf16 %v882_v4, %v881_v50 }
 0x227   :  { %v518_v33 = vrot.slane %v1809_v49, %v1807_v7 }
 0x228   :  { %v388_v44 = vpop.xlane.xlu1 %387  ;;  %1134 = vmatpush3.bf16.msra.mxu1 %v1133_v41  ;;  %v2036_v41 = vld [vmem:[#allocation29_spill] sm:$0xff] }
 0x229   :  { %v604_v14 = vrot.slane %v388_v44, %v1807_v7  ;;  %v513_v7 = vsel %vm512_vm12, %v511_v15, %v506_v24  ;;  %v600_v44 = vsel %vm512_vm12, %v599_v21, %v595_v59  ;;  %v883_v15 = vld [vmem:[#allocation11 + $0x10] sm:$0xff]  ;;  %v884_v21 = vld [vmem:[#allocation11 + $0x18] sm:$0xff]  ;;  %1135 = vmatprep.subr.bf16.mxu1 %v2032_v32 }
 0x22a   :  { %v343_v16 = vpop.xlane.xlu0 %342  ;;  %v520_v63 = vsel %vm519_vm13, %v518_v33, %v513_v7  ;;  %v1136_v33 = vpack.c.bf16 %v884_v21, %v883_v15 }
 0x22b   :  { %v525_v42 = vrot.slane %v343_v16, %v1812_v39 }
 0x22c   :  { %v391_v57 = vpop.xlane.xlu1 %390  ;;  %1137 = vmatpush3.bf16.msra.mxu1 %v1136_v33  ;;  %v2037_v33 = vld [vmem:[#allocation25_spill] sm:$0xff] }
 0x22d   :  { %v609_v19 = vrot.slane %v391_v57, %v1812_v39  ;;  %v605_v39 = vsel %vm519_vm13, %v604_v14, %v600_v44  ;;  %v527_v54 = vsel %vm526_vm14, %v525_v42, %v520_v63 }
 0x22e   :  { %v346_v9 = vpop.xlane.xlu0 %345 }
 0x22f   :  { %v532_v35 = vrot.slane %v346_v9, %v1821_v18  ;;  %v610_v48 = vsel %vm526_vm14, %v609_v19, %v605_v39  ;;  %v879_v9 = vld [vmem:[#allocation10 + $0x10] sm:$0xff] }
 0x230   :  { %v394_v5 = vpop.xlane.xlu1 %393  ;;  %v1142_v11 = vpack.c.bf16 %v880_v25, %v879_v9  ;;  %v2035_v9 = vld [vmem:[#allocation24_spill] sm:$0xff] }
 0x231   :  { %v614_v38 = vrot.slane %v394_v5, %v1821_v18  ;;  %v534_v61 = vsel %vm533_vm15, %v532_v35, %v527_v54 }
 0x232   :  { %v349_v49 = vpop.xlane.xlu0 %348 }
 0x233   :  { %v539_v28 = vrot.slane %v349_v49, %v1824_v45  ;;  %v615_v16 = vsel %vm533_vm15, %v614_v38, %v610_v48 }
 0x234   :  { %v397_v47 = vpop.xlane.xlu1 %396 }
 0x235   :  { %v619_v18 = vrot.slane %v397_v47, %v1824_v45  ;;  %v541_v51 = vsel %vm540_vm0, %v539_v28, %v534_v61 }
 0x237   :  { %v620_v29 = vsel %vm540_vm0, %v619_v18, %v615_v16 }
 0x238   :  { %v622_v0 = vsel %vm621_vm2, %v620_v29, %v541_v51 }
 0x239   :  { %v624_v53 = vsel %vm400_vm3, %v622_v0, -inf }
 0x23a   :  { %v626_v12 = vsel %vm625_vm4, %v624_v53, -inf }
 0x23b   :  { %627 = vmax.xlane.f32.xlu0 %v626_v12 }
 0x2c8   :  { %v628_v56 = vpop.xlane.xlu0 %627 }
 0x2c9   :  { %v629_v55 = vsub.f32 %v624_v53, %v628_v56 }
 0x2cb   :  { %v630_v36 = vmul.f32 1.442695, %v629_v55 }
 0x2cd   :  { %1159 = vpow2.f32 %v630_v36 }
 0x2d7   :  { %v1160_v57 = vpop.eup %1159 }
 0x2d8   :  { %v632_v60 = vsel %vm625_vm4, %v1160_v57, 0.0 }
 0x2d9   :  { %633 = vadd.xlane.f32.xlu1 %v632_v60 }
 0x366   :  { %v634_v45 = vpop.xlane.xlu1 %633 }
 0x367   :  { %1161 = vrcp.f32 %v634_v45 }
 0x371   :  { %v1162_v17 = vpop.eup %1161 }
 0x372   :  { %v636_v62 = vmul.f32 %v1162_v17, %v1160_v57 }
 0x374   :  { %v640_v2 = vrot.slane %v636_v62, %v1547_v20  ;;  %1040 = vst [vmem:[#allocation15] sm:$0x3] %v636_v62  ;;  %v707_v22 = vrot.slane %v636_v62, %v706_v6  ;;  %v878_v20 = vld [vmem:[#allocation10 + $0x8] sm:$0xff] }
 0x375   :  { %v1139_v3 = vpack.c.bf16 %v878_v20, %v877_v13  ;;  %v2033_v6 = vld [vmem:[#allocation23_spill] sm:$0xff] }
 0x376   :  { %646 = vbcast.lane.b32.xlu1 %v640_v2, 264  ;;  %642 = vbcast.lane.b32.xlu0 %v640_v2, 256 }
 0x377   :  { %1140 = vmatpush3.bf16.msra.mxu0 %v1139_v3 }
 0x378   :  { %1141 = vmatprep.subr.bf16.mxu0 %v2032_v32 }
 0x37a   :  { %709 = vbcast.lane.b32.xlu1 %v707_v22, 256  ;;  %650 = vbcast.lane.b32.xlu0 %v640_v2, 272 }
 0x37b   :  { %1143 = vmatpush3.bf16.msra.mxu0 %v1142_v11 }
 0x37e   :  { %713 = vbcast.lane.b32.xlu1 %v707_v22, 264  ;;  %654 = vbcast.lane.b32.xlu0 %v640_v2, 280 }
 0x37f   :  { %1124 = vmatmul.mubr.msk.f32.vlgmr.msra.gmra.mrb[2].mxu0 %vm163_vm1, %v1536_v8 }
 0x382   :  { %717 = vbcast.lane.b32.xlu1 %v707_v22, 272  ;;  %658 = vbcast.lane.b32.xlu0 %v640_v2, 288 }
 0x386   :  { %721 = vbcast.lane.b32.xlu1 %v707_v22, 280  ;;  %662 = vbcast.lane.b32.xlu0 %v640_v2, 296 }
 0x38a   :  { %725 = vbcast.lane.b32.xlu1 %v707_v22, 288  ;;  %666 = vbcast.lane.b32.xlu0 %v640_v2, 304 }
 0x38e   :  { %729 = vbcast.lane.b32.xlu1 %v707_v22, 296  ;;  %670 = vbcast.lane.b32.xlu0 %v640_v2, 312 }
 0x392   :  { %733 = vbcast.lane.b32.xlu1 %v707_v22, 304  ;;  %674 = vbcast.lane.b32.xlu0 %v640_v2, 320 }
 0x396   :  { %737 = vbcast.lane.b32.xlu1 %v707_v22, 312  ;;  %678 = vbcast.lane.b32.xlu0 %v640_v2, 328 }
 0x39a   :  { %741 = vbcast.lane.b32.xlu1 %v707_v22, 320  ;;  %682 = vbcast.lane.b32.xlu0 %v640_v2, 336 }
 0x39e   :  { %745 = vbcast.lane.b32.xlu1 %v707_v22, 328  ;;  %686 = vbcast.lane.b32.xlu0 %v640_v2, 344 }
 0x3a2   :  { %749 = vbcast.lane.b32.xlu1 %v707_v22, 336  ;;  %690 = vbcast.lane.b32.xlu0 %v640_v2, 352 }
 0x3a6   :  { %753 = vbcast.lane.b32.xlu1 %v707_v22, 344  ;;  %694 = vbcast.lane.b32.xlu0 %v640_v2, 360 }
 0x3aa   :  { %757 = vbcast.lane.b32.xlu1 %v707_v22, 352  ;;  %698 = vbcast.lane.b32.xlu0 %v640_v2, 368 }
 0x3ae   :  { %761 = vbcast.lane.b32.xlu1 %v707_v22, 360  ;;  %702 = vbcast.lane.b32.xlu0 %v640_v2, 376 }
 0x3b2   :  { %765 = vbcast.lane.b32.xlu1 %v707_v22, 368 }
 0x3b6   :  { %769 = vbcast.lane.b32.xlu1 %v707_v22, 376  ;;  %v2034_v22 = vld [vmem:[#allocation27_spill] sm:$0xff] }
 0x3e8   :  { %v647_v14 = vpop.permute.xlu1 %646  ;;  %v643_v5 = vpop.permute.xlu0 %642 }
 0x3e9   :  { %v772_v63 = vmul.f32 %v647_v14, %v1556_v27  ;;  %v771_v39 = vmul.f32 %v643_v5, %v1549_v23 }
 0x3eb   :  { %v804_v48 = vsel %vm163_vm1, %v772_v63, 0.0  ;;  %v803_v18 = vsel %vm163_vm1, %v771_v39, 0.0 }
 0x3ec   :  { %v710_v31 = vpop.permute.xlu1 %709  ;;  %v651_v10 = vpop.permute.xlu0 %650  ;;  %v805_v29 = vadd.f32 %v804_v48, %v803_v18  ;;  %v2042_v18 = vld [vmem:[#allocation35_spill] sm:$0xff] }
 0x3ed   :  { %v773_v8 = vmul.f32 %v651_v10, %v1570_v34  ;;  %v787_v12 = vmul.f32 %v710_v31, %v1554_v26  ;;  %v2038_v31 = vld [vmem:[#allocation31_spill] sm:$0xff] }
 0x3ef   :  { %v806_v16 = vsel %vm163_vm1, %v773_v8, 0.0  ;;  %v840_v26 = vsel %vm163_vm1, %v787_v12, 0.0  ;;  %v2044_v12 = vld [vmem:[#allocation37_spill] sm:$0xff] }
 0x3f0   :  { %v714_v42 = vpop.permute.xlu1 %713  ;;  %v655_v19 = vpop.permute.xlu0 %654  ;;  %v807_v56 = vadd.f32 %v806_v16, %v805_v29 }
 0x3f1   :  { %v774_v61 = vmul.f32 %v655_v19, %v1580_v40  ;;  %v788_v27 = vmul.f32 %v714_v42, %v1563_v30 }
 0x3f3   :  { %v808_v23 = vsel %vm163_vm1, %v774_v61, 0.0  ;;  %v841_v45 = vsel %vm163_vm1, %v788_v27, 0.0  ;;  %v2043_v27 = vld [vmem:[#allocation30_spill] sm:$0xff] }
 0x3f4   :  { %v718_v24 = vpop.permute.xlu1 %717  ;;  %v659_v59 = vpop.permute.xlu0 %658  ;;  %v809_v57 = vadd.f32 %v808_v23, %v807_v56  ;;  %v842_v20 = vadd.f32 %v841_v45, %v840_v26 }
 0x3f5   :  { %v775_v51 = vmul.f32 %v659_v59, %v1590_v46  ;;  %v789_v55 = vmul.f32 %v718_v24, %v1575_v37 }
 0x3f7   :  { %v810_v40 = vsel %vm163_vm1, %v775_v51, 0.0  ;;  %v843_v37 = vsel %vm163_vm1, %v789_v55, 0.0 }
 0x3f8   :  { %v722_v35 = vpop.permute.xlu1 %721  ;;  %v663_v38 = vpop.permute.xlu0 %662  ;;  %v811_v62 = vadd.f32 %v810_v40, %v809_v57  ;;  %v844_v21 = vadd.f32 %v843_v37, %v842_v20  ;;  %v2045_v57 = vld [vmem:[#allocation32_spill] sm:$0xff] }
 0x3f9   :  { %v776_v34 = vmul.f32 %v663_v38, %v1600_v52  ;;  %v790_v30 = vmul.f32 %v722_v35, %v1585_v43  ;;  %v2039_v38 = vld [vmem:[#allocation26_spill] sm:$0xff] }
 0x3fb   :  { %v812_v17 = vsel %vm163_vm1, %v776_v34, 0.0  ;;  %v845_v43 = vsel %vm163_vm1, %v790_v30, 0.0 }
 0x3fc   :  { %v726_v49 = vpop.permute.xlu1 %725  ;;  %v667_v7 = vpop.permute.xlu0 %666  ;;  %v813_v50 = vadd.f32 %v812_v17, %v811_v62  ;;  %v846_v42 = vadd.f32 %v845_v43, %v844_v21  ;;  %v2046_v62 = vld [vmem:[#allocation34_spill] sm:$0xff] }
 0x3fd   :  { %v777_v36 = vmul.f32 %v667_v7, %v1610_v58  ;;  %v791_v2 = vmul.f32 %v726_v49, %v2033_v6 }
 0x3ff   :  { %v814_v58 = vsel %vm163_vm1, %v777_v36, 0.0  ;;  %v847_v32 = vsel %vm163_vm1, %v791_v2, 0.0  ;;  %v2047_v2 = vld [vmem:[#allocation39_spill] sm:$0xff] }
 0x400   :  { %v730_v44 = vpop.permute.xlu1 %729  ;;  %v671_v28 = vpop.permute.xlu0 %670  ;;  %v815_v11 = vadd.f32 %v814_v58, %v813_v50  ;;  %v848_v63 = vadd.f32 %v847_v32, %v846_v42  ;;  %v2048_v50 = vld [vmem:[#allocation36_spill] sm:$0xff] }
 0x401   :  { %v778_v52 = vmul.f32 %v671_v28, %v1620_v1  ;;  %v792_v25 = vmul.f32 %v730_v44, %v2035_v9  ;;  %v2040_v44 = vld [vmem:[#allocation33_spill] sm:$0xff] }
 0x403   :  { %v816_v1 = vsel %vm163_vm1, %v778_v52, 0.0  ;;  %v849_v35 = vsel %vm163_vm1, %v792_v25, 0.0 }
 0x404   :  { %v734_v47 = vpop.permute.xlu1 %733  ;;  %v675_v54 = vpop.permute.xlu0 %674  ;;  %v817_v19 = vadd.f32 %v816_v1, %v815_v11  ;;  %v850_v16 = vadd.f32 %v849_v35, %v848_v63  ;;  %v2050_v11 = vld [vmem:[#allocation41_spill] sm:$0xff] }
 0x405   :  { %v779_v13 = vmul.f32 %v675_v54, %v2034_v22  ;;  %v793_v14 = vmul.f32 %v734_v47, %v2037_v33  ;;  %v2041_v47 = vld [vmem:[#allocation28_spill] sm:$0xff] }
 0x407   :  { %v818_v5 = vsel %vm163_vm1, %v779_v13, 0.0  ;;  %v851_v8 = vsel %vm163_vm1, %v793_v14, 0.0 }
 0x408   :  { %v738_v0 = vpop.permute.xlu1 %737  ;;  %v679_v53 = vpop.permute.xlu0 %678  ;;  %v819_v39 = vadd.f32 %v818_v5, %v817_v19  ;;  %v852_v55 = vadd.f32 %v851_v8, %v850_v16 }
 0x409   :  { %v780_v15 = vmul.f32 %v679_v53, %v2036_v41  ;;  %v794_v49 = vmul.f32 %v738_v0, %v2039_v38 }
 0x40b   :  { %v820_v7 = vsel %vm163_vm1, %v780_v15, 0.0  ;;  %v853_v0 = vsel %vm163_vm1, %v794_v49, 0.0  ;;  %v2049_v15 = vld [vmem:[#allocation38_spill] sm:$0xff] }
 0x40c   :  { %v742_v46 = vpop.permute.xlu1 %741  ;;  %v683_v60 = vpop.permute.xlu0 %682  ;;  %v821_v51 = vadd.f32 %v820_v7, %v819_v39  ;;  %v854_v45 = vadd.f32 %v853_v0, %v852_v55  ;;  %v2052_v39 = vld [vmem:[#allocation42_spill] sm:$0xff] }
 0x40d   :  { %v781_v10 = vmul.f32 %v683_v60, %v2038_v31  ;;  %v795_v54 = vmul.f32 %v742_v46, %v2041_v47 }
 0x40f   :  { %v822_v48 = vsel %vm163_vm1, %v781_v10, 0.0  ;;  %v855_v36 = vsel %vm163_vm1, %v795_v54, 0.0 }
 0x410   :  { %v746_v3 = vpop.permute.xlu1 %745  ;;  %v687_v4 = vpop.permute.xlu0 %686  ;;  %v823_v40 = vadd.f32 %v822_v48, %v821_v51  ;;  %v856_v22 = vadd.f32 %v855_v36, %v854_v45 }
 0x411   :  { %v782_v28 = vmul.f32 %v687_v4, %v2040_v44  ;;  %v796_v23 = vmul.f32 %v746_v3, %v2043_v27 }
 0x413   :  { %v824_v34 = vsel %vm163_vm1, %v782_v28, 0.0  ;;  %v857_v26 = vsel %vm163_vm1, %v796_v23, 0.0 }
 0x414   :  { %v750_v24 = vpop.permute.xlu1 %749  ;;  %v691_v59 = vpop.permute.xlu0 %690  ;;  %v825_v30 = vadd.f32 %v824_v34, %v823_v40  ;;  %v858_v43 = vadd.f32 %v857_v26, %v856_v22 }
 0x415   :  { %v783_v61 = vmul.f32 %v691_v59, %v2042_v18  ;;  %v797_v46 = vmul.f32 %v750_v24, %v2045_v57  ;;  %v2051_v59 = vld [vmem:[#allocation40_spill] sm:$0xff] }
 0x417   :  { %v826_v60 = vsel %vm163_vm1, %v783_v61, 0.0  ;;  %v859_v20 = vsel %vm163_vm1, %v797_v46, 0.0 }
 0x418   :  { %v754_v29 = vpop.permute.xlu1 %753  ;;  %v695_v53 = vpop.permute.xlu0 %694  ;;  %v827_v13 = vadd.f32 %v826_v60, %v825_v30  ;;  %v860_v33 = vadd.f32 %v859_v20, %v858_v43 }
 0x419   :  { %v784_v56 = vmul.f32 %v695_v53, %v2044_v12  ;;  %v798_v37 = vmul.f32 %v754_v29, %v2046_v62 }
 0x41b   :  { %v828_v6 = vsel %vm163_vm1, %v784_v56, 0.0  ;;  %v861_v41 = vsel %vm163_vm1, %v798_v37, 0.0 }
 0x41c   :  { %v758_v17 = vpop.permute.xlu1 %757  ;;  %v699_v52 = vpop.permute.xlu0 %698  ;;  %v829_v9 = vadd.f32 %v828_v6, %v827_v13  ;;  %v862_v10 = vadd.f32 %v861_v41, %v860_v33 }
 0x41d   :  { %v785_v58 = vmul.f32 %v699_v52, %v2047_v2  ;;  %v799_v3 = vmul.f32 %v758_v17, %v2048_v50 }
 0x41f   :  { %v830_v4 = vsel %vm163_vm1, %v785_v58, 0.0  ;;  %v863_v5 = vsel %vm163_vm1, %v799_v3, 0.0 }
 0x420   :  { %v762_v25 = vpop.permute.xlu1 %761  ;;  %v703_v1 = vpop.permute.xlu0 %702  ;;  %v831_v14 = vadd.f32 %v830_v4, %v829_v9  ;;  %v864_v38 = vadd.f32 %v863_v5, %v862_v10 }
 0x421   :  { %v800_v21 = vmul.f32 %v762_v25, %v2049_v15  ;;  %v786_v32 = vmul.f32 %v703_v1, %v2050_v11 }
 0x423   :  { %v832_v31 = vsel %vm163_vm1, %v786_v32, 0.0  ;;  %v865_v24 = vsel %vm163_vm1, %v800_v21, 0.0 }
 0x424   :  { %v833_v42 = vadd.f32 %v832_v31, %v831_v14  ;;  %v766_v19 = vpop.permute.xlu1 %765  ;;  %v866_v44 = vadd.f32 %v865_v24, %v864_v38 }
 0x425   :  { %v801_v35 = vmul.f32 %v766_v19, %v2051_v59 }
 0x426   :  { %v834_v49 = vrot.slane %v833_v42, 4 }
 0x427   :  { %v867_v7 = vsel %vm163_vm1, %v801_v35, 0.0 }
 0x428   :  { %v835_v28 = vadd.f32 %v834_v49, %v833_v42  ;;  %v770_v63 = vpop.permute.xlu1 %769  ;;  %v868_v47 = vadd.f32 %v867_v7, %v866_v44 }
 0x429   :  { %v802_v8 = vmul.f32 %v770_v63, %v2052_v39 }
 0x42a   :  { %v836_v48 = vrot.slane %v835_v28, 2 }
 0x42b   :  { %v869_v54 = vsel %vm163_vm1, %v802_v8, 0.0 }
 0x42c   :  { %v870_v18 = vadd.f32 %v869_v54, %v868_v47  ;;  %v837_v16 = vadd.f32 %v836_v48, %v835_v28 }
 0x42e   :  { %v871_v61 = vrot.slane %v870_v18, 4  ;;  %v838_v53 = vrot.slane %v837_v16, 1 }
 0x430   :  { %v872_v51 = vadd.f32 %v871_v61, %v870_v18  ;;  %v839_v23 = vadd.f32 %v838_v53, %v837_v16 }
 0x432   :  { %v873_v29 = vrot.slane %v872_v51, 2 }
 0x434   :  { %v874_v0 = vadd.f32 %v873_v29, %v872_v51 }
 0x436   :  { %v875_v27 = vrot.slane %v874_v0, 1 }
 0x438   :  { %v876_v34 = vadd.f32 %v875_v27, %v874_v0 }
 0x43a   :  { %v887_v12 = vsel %vm621_vm2, %v876_v34, %v839_v23 }
 0x43b   :  { %1113 = vmatmul.mubr.msk.f32.vlgmr.msra.gmra.mrb[0].mxu1 %vm163_vm1, %v887_v12 }
 0x452   :  { %v1026_v56 = vpop.f32.mrb[2].mxu0 }
 0x453   :  { %v1125_v55 = vpop.f32.mrb[3].mxu0 }
 0x454   :  { %1330 = shalt.err (!%p1327_p4)
}
 0x455   :  { %s1331_s24 = scalar_lea.hbm %s1989_s8, 32 }
 0x456   :  { %p1332_p5 = scmp.ne.s32.totalorder %s1989_s8, %s1331_s24  ;;  %p1335_p6 = scmp.lt.u32.totalorder %s1331_s24, %s1989_s8 }
 0x458   :  { %p1337_p7 = pnand %p1335_p6, %p1332_p5 }
 0x45a   :  { %1340 = shalt.err (!%p1337_p7)
}
 0x45b   :  { %1060 = dma.vmem_to_hbm [thread:$0]  %s1058_s16, 32, %s1989_s8, [#allocation16]   ;;  %v1077_v36 = vld [vmem:[#allocation13] ss:$0 sm:$0xff] }
 0x45c   :  { %s1389_s9 = smov [#allocation14]  }
 0x45d   :  { %s1047_s10 = sshll.u32 %s1389_s9, 4  ;;  %s1048_s10 = int_to_ptr.vmem [resolvable:$true] %s1047_s10 }
 0x45e   :  { %s1341_s5 = scalar_lea.vmem %s1048_s10, 32  ;;  %p1346_p9 = scmp.lt.s32.totalorder %s1048_s10, %s1048_s10 }
 0x45f   :  { %p1342_p8 = scmp.ne.s32.totalorder %s1048_s10, %s1341_s5  ;;  %p1347_p10 = scmp.lt.s32.totalorder %s1341_s5, %s1341_s5 }
 0x461   :  { %p1348_p11 = por %p1347_p10, %p1346_p9 }
 0x463   :  { %p1349_p12 = pnand %p1348_p11, %p1342_p8 }
 0x50e   :  { %v956_v40 = vpop.f32.mrb[0].mxu1 }
 0x50f   :  { %v1027_v57 = vadd.f32 %v1026_v56, %v956_v40  ;;  %v1114_v46 = vpop.f32.mrb[1].mxu1 }
 0x511   :  { %v1037_v60 = vadd.f32 %v1077_v36, %v1027_v57 }
 0x513   :  { %1163 = vtanh.f32 %v1037_v60 }
 0x51d   :  { %v1164_v45 = vpop.eup %1163 }
 0x51e   :  { %1039 = vst [vmem:[#allocation14] sm:$0x3] %v1164_v45 }
 0x51f   :  { %1352 = shalt.err (!%p1349_p12)
}
 0x520   :  { %s1353_s26 = scalar_lea.hbm %s1988_s7, 32 }
 0x521   :  { %p1354_p13 = scmp.ne.s32.totalorder %s1988_s7, %s1353_s26  ;;  %p1357_p0 = scmp.lt.u32.totalorder %s1353_s26, %s1988_s7 }
 0x523   :  { %p1359_p1 = pnand %p1357_p0, %p1354_p13 }
 0x525   :  { %1362 = shalt.err (!%p1359_p1)
}
 0x526   :  { %1050 = dma.vmem_to_hbm [thread:$0]  %s1048_s10, 32, %s1988_s7, [#allocation4]  }
 0x527   :  { %1371 = dma.done.wait [#allocation4], 32  }
 0x528   :  { %1372 = vsyncadd [#allocation4], 4294967264 }
 0x529   :  { %1373 = dma.done.wait [#allocation16], 32  }
 0x52a   :  { %1374 = vsyncadd [#allocation16], 4294967264 }
 0x52b   :  { %1067 = vsyncpa [#allocation3], 1 }
 0x52c   :  { %1068 = vsyncpa [#allocation6], 1 }
 0x52d   :  { %1069 = vsyncpa [#allocation9], 1 }
 0x52e   :  { %1070 = vsyncpa [#allocation12], 1 }
 0x52f   :  { %1071 = vsyncpa [#allocation4], 1 }
 0x530   :  { %1072 = vsyncpa [#allocation16], 1 }

</bundles_post_ra>
